<compile_context>
chip_gen: v7x
topology: tpu7x:2x2x1
jax: 0.10.0
libtpu: 0.0.40
codegen_flags: <defaults>
</compile_context>

<pallas_src>
import functools

import jax
import jax.numpy as jnp
from jax.experimental import pallas as pl
from jax.experimental.pallas import tpu as pltpu

D_IN, D_HID, D_OUT = 1024, 512, 128


def _round_up(x, m):
    return (x + m - 1) // m * m


def pb_tucker_kernel(x_ref, w1_ref, b1_ref, w2_ref, b2_ref, o_ref):
    # x_ref : (tm, 1024) bf16   w1_ref: (1024, 512) bf16   b1_ref: (1, 512) f32
    # w2_ref: (512, 128) bf16   b2_ref: (1, 128)   f32     o_ref : (tm, 128) f32
    h = jnp.dot(x_ref[...], w1_ref[...], preferred_element_type=jnp.float32)
    h = jnp.tanh(h + b1_ref[...])                      # bias add fused into tanh arg, f32
    y = jnp.dot(h.astype(jnp.bfloat16), w2_ref[...],   # back to bf16 for the MXU
                preferred_element_type=jnp.float32)
    o_ref[...] = (y + b2_ref[...]).astype(o_ref.dtype)


def _resident_spec(shape):
    # Grid-invariant operand: constant index_map (never re-fetched), so a
    # single VMEM buffer suffices -> saves the weight double-buffer VMEM.
    return pl.BlockSpec(shape, lambda i: (0,) * len(shape),
                        pipeline_mode=pl.Buffered(1))


@functools.partial(jax.jit, static_argnames=("tm",))
def pb_tucker_forward(x, w1, b1, w2, b2, *, tm=512):
    """y = tanh(x @ w1 + b1) @ w2 + b2 with weights stored (in, out)."""
    assert x.ndim == 2 and x.shape[1] == D_IN
    assert tm % 8 == 0, "tile must be sublane-aligned"
    n = x.shape[0]

    # Shrink the tile for tiny batches, then pad the batch to a tile multiple.
    tm_eff = min(tm, _round_up(n, 8))
    n_pad = _round_up(n, tm_eff)
    if n_pad != n:
        x = jnp.pad(x, ((0, n_pad - n), (0, 0)))
    grid = (n_pad // tm_eff,)

    # bf16 operands for the MXU; biases / accumulation / tanh stay f32.
    x_bf = x.astype(jnp.bfloat16)
    w1_bf = w1.astype(jnp.bfloat16)
    w2_bf = w2.astype(jnp.bfloat16)
    b1_f = b1.reshape(1, D_HID).astype(jnp.float32)
    b2_f = b2.reshape(1, D_OUT).astype(jnp.float32)

    cost = pl.CostEstimate(
        flops=2 * n_pad * (D_IN * D_HID + D_HID * D_OUT),
        transcendentals=n_pad * D_HID,
        bytes_accessed=(x_bf.size * 2 + w1_bf.size * 2 + w2_bf.size * 2
                        + b1_f.size * 4 + b2_f.size * 4 + n_pad * D_OUT * 4),
    )

    out = pl.pallas_call(
        pb_tucker_kernel,
        out_shape=jax.ShapeDtypeStruct((n_pad, D_OUT), jnp.float32),
        grid_spec=pltpu.PrefetchScalarGridSpec(
            num_scalar_prefetch=0,
            grid=grid,
            in_specs=[
                pl.BlockSpec((tm_eff, D_IN), lambda i: (i, 0)),  # x tile (double-buffered)
                _resident_spec((D_IN, D_HID)),                   # W1 (resident)
                _resident_spec((1, D_HID)),                      # b1
                _resident_spec((D_HID, D_OUT)),                  # W2 (resident)
                _resident_spec((1, D_OUT)),                      # b2
            ],
            out_specs=pl.BlockSpec((tm_eff, D_OUT), lambda i: (i, 0)),
        ),
        compiler_params=pltpu.CompilerParams(
            dimension_semantics=("parallel",),   # shards across v7x's 2 TCs when grid >= 2
        ),
        cost_estimate=cost,
    )(x_bf, w1_bf, b1_f, w2_bf, b2_f)

    return out[:n] if n_pad != n else out


def init_params(key):
    """Deterministic synthetic init mimicking nn.Linear's uniform(-1/sqrt(fan_in), +) init."""
    k1, k2, k3, k4 = jax.random.split(key, 4)
    lim1 = 1.0 / jnp.sqrt(D_IN)
    lim2 = 1.0 / jnp.sqrt(D_HID)
    # Stored pre-transposed: (in_features, out_features)
    w1 = jax.random.uniform(k1, (D_IN, D_HID), jnp.float32, -lim1, lim1)
    b1 = jax.random.uniform(k2, (1, D_HID), jnp.float32, -lim1, lim1)
    w2 = jax.random.uniform(k3, (D_HID, D_OUT), jnp.float32, -lim2, lim2)
    b2 = jax.random.uniform(k4, (1, D_OUT), jnp.float32, -lim2, lim2)
    return w1, b1, w2, b2


def reference_forward(x, w1, b1, w2, b2):
    return jnp.tanh(x @ w1 + b1) @ w2 + b2


if __name__ == "__main__":
    key = jax.random.PRNGKey(0)
    kx, kp = jax.random.split(key)

    batch = 12   # deliberately not a multiple of 8 -> exercises the padding path
    x = jax.random.normal(kx, (batch, D_IN), dtype=jnp.float32)
    w1, b1, w2, b2 = init_params(kp)

    out = pb_tucker_forward(x, w1, b1, w2, b2)
    out = jax.block_until_ready(out)

    ref = reference_forward(x, w1, b1, w2, b2)
    assert out.shape == (batch, D_OUT)
    # bf16 MXU operands with f32 accumulation -> ~1e-3 abs error vs the f32 reference.
    assert jnp.allclose(out, ref, atol=2e-2, rtol=2e-2), "mismatch vs. pure-JAX reference"

    print("KERNEL_OK")
</pallas_src>

<mosaic_0001>
module attributes {stable_mosaic.version = 11 : i64} {
  func.func @pb_tucker_kernel(%arg0: i32, %arg1: memref<16x1024xbf16, #tpu.memory_space<vmem>>, %arg2: memref<1024x512xbf16, #tpu.memory_space<vmem>>, %arg3: memref<1x512xf32, #tpu.memory_space<vmem>>, %arg4: memref<512x128xbf16, #tpu.memory_space<vmem>>, %arg5: memref<1x128xf32, #tpu.memory_space<vmem>>, %arg6: memref<16x128xf32, #tpu.memory_space<vmem>>) attributes {dimension_semantics = [#tpu.dimension_semantics<parallel>], iteration_bounds = array<i64: 1>, scalar_prefetch = 0 : i64, scratch_operands = 0 : i64, tpu.core_type = #tpu.core_type<tc>, window_params = [{transform_indices = @transform_0, window_bounds = array<i64: 16, 1024>}, {pipeline_mode = #tpu.pipeline_mode<synchronous>, transform_indices = @transform_1, window_bounds = array<i64: 1024, 512>}, {pipeline_mode = #tpu.pipeline_mode<synchronous>, transform_indices = @transform_2, window_bounds = array<i64: 1, 512>}, {pipeline_mode = #tpu.pipeline_mode<synchronous>, transform_indices = @transform_3, window_bounds = array<i64: 512, 128>}, {pipeline_mode = #tpu.pipeline_mode<synchronous>, transform_indices = @transform_4, window_bounds = array<i64: 1, 128>}, {transform_indices = @transform_5, window_bounds = array<i64: 16, 128>}]} {
    %c0 = arith.constant 0 : index
    %c0_0 = arith.constant 0 : index
    %0 = vector.load %arg1[%c0, %c0_0] : memref<16x1024xbf16, #tpu.memory_space<vmem>>, vector<16x1024xbf16>
    %c0_1 = arith.constant 0 : index
    %c0_2 = arith.constant 0 : index
    %1 = vector.load %arg2[%c0_1, %c0_2] : memref<1024x512xbf16, #tpu.memory_space<vmem>>, vector<1024x512xbf16>
    %cst = arith.constant dense<0.000000e+00> : vector<16x512xf32>
    %2 = tpu.matmul %0, %1, %cst {dimension_numbers = #tpu.dot_dimension_numbers<[1], [0], [0], [1], [0, 0, 1, 1], [], []>} : vector<16x1024xbf16>, vector<1024x512xbf16>, vector<16x512xf32> -> vector<16x512xf32>
    %c0_3 = arith.constant 0 : index
    %c0_4 = arith.constant 0 : index
    %3 = vector.load %arg3[%c0_3, %c0_4] : memref<1x512xf32, #tpu.memory_space<vmem>>, vector<1x512xf32>
    %4 = vector.broadcast %3 : vector<1x512xf32> to vector<16x512xf32>
    %5 = arith.addf %2, %4 : vector<16x512xf32>
    %6 = math.tanh %5 : vector<16x512xf32>
    %7 = arith.truncf %6 : vector<16x512xf32> to vector<16x512xbf16>
    %c0_5 = arith.constant 0 : index
    %c0_6 = arith.constant 0 : index
    %8 = vector.load %arg4[%c0_5, %c0_6] : memref<512x128xbf16, #tpu.memory_space<vmem>>, vector<512x128xbf16>
    %cst_7 = arith.constant dense<0.000000e+00> : vector<16x128xf32>
    %9 = tpu.matmul %7, %8, %cst_7 {dimension_numbers = #tpu.dot_dimension_numbers<[1], [0], [0], [1], [0, 0, 1, 1], [], []>} : vector<16x512xbf16>, vector<512x128xbf16>, vector<16x128xf32> -> vector<16x128xf32>
    %c0_8 = arith.constant 0 : index
    %c0_9 = arith.constant 0 : index
    %10 = vector.load %arg5[%c0_8, %c0_9] : memref<1x128xf32, #tpu.memory_space<vmem>>, vector<1x128xf32>
    %11 = vector.broadcast %10 : vector<1x128xf32> to vector<16x128xf32>
    %12 = arith.addf %9, %11 : vector<16x128xf32>
    %c0_10 = arith.constant 0 : index
    %c0_11 = arith.constant 0 : index
    %13 = vector.load %arg6[%c0_10, %c0_11] : memref<16x128xf32, #tpu.memory_space<vmem>>, vector<16x128xf32>
    tpu.vector_store %arg6[%c0_10, %c0_11], %12 {strides = array<i32>} : memref<16x128xf32, #tpu.memory_space<vmem>>, vector<16x128xf32>,
    return
  }
  func.func @transform_0(%arg0: i32) -> (i32, i32) {
    %c0_i32 = arith.constant 0 : i32
    %c0_i32_0 = arith.constant 0 : i32
    return %arg0, %c0_i32 : i32, i32
  }
  func.func @transform_1(%arg0: i32) -> (i32, i32) {
    %c0_i32 = arith.constant 0 : i32
    %c0_i32_0 = arith.constant 0 : i32
    %c0_i32_1 = arith.constant 0 : i32
    return %c0_i32, %c0_i32_0 : i32, i32
  }
  func.func @transform_2(%arg0: i32) -> (i32, i32) {
    %c0_i32 = arith.constant 0 : i32
    %c0_i32_0 = arith.constant 0 : i32
    %c0_i32_1 = arith.constant 0 : i32
    return %c0_i32, %c0_i32_0 : i32, i32
  }
  func.func @transform_3(%arg0: i32) -> (i32, i32) {
    %c0_i32 = arith.constant 0 : i32
    %c0_i32_0 = arith.constant 0 : i32
    %c0_i32_1 = arith.constant 0 : i32
    return %c0_i32, %c0_i32_0 : i32, i32
  }
  func.func @transform_4(%arg0: i32) -> (i32, i32) {
    %c0_i32 = arith.constant 0 : i32
    %c0_i32_0 = arith.constant 0 : i32
    %c0_i32_1 = arith.constant 0 : i32
    return %c0_i32, %c0_i32_0 : i32, i32
  }
  func.func @transform_5(%arg0: i32) -> (i32, i32) {
    %c0_i32 = arith.constant 0 : i32
    %c0_i32_0 = arith.constant 0 : i32
    return %arg0, %c0_i32 : i32, i32
  }
}

</mosaic_0001>

<bundles_post_ra>
// kernel: pb_tucker_forward.1
= control target key start
LH: loop header
LB: loop body
LE: loop exit
PB: predicated region body
PF: predicated region fallthrough
CT: control target
= control target key end

     0   :  { %s4142_s0 = inlined_call_operand.vmem [shape: bf16[16,1024], index: 0, kind: input, shape index: {}]   ;;  %s4143_s1 = inlined_call_operand.vmem [shape: bf16[1024,512], index: 1, kind: input, shape index: {}]   ;;  %s4144_s2 = inlined_call_operand.vmem [shape: f32[1,512], index: 2, kind: input, shape index: {}]   ;;  %s4145_s3 = inlined_call_operand.vmem [shape: bf16[512,128], index: 3, kind: input, shape index: {}]   ;;  %s4146_s4 = inlined_call_operand.vmem [shape: f32[1,128], index: 4, kind: input, shape index: {}]   ;;  %s4147_s5 = inlined_call_operand.hbm [shape: f32[16,128], index: 5, kind: output, shape index: {}]  }
   0x1   :  { %v2723_v0 = vld [vmem:[%s4143_s1 + $0x4] ss:$16 sps:$4 sm:$0xff]   ;;  %v2725_v1 = vld [vmem:[%s4143_s1 + $0xc] ss:$16 sps:$4 sm:$0xff]   ;;  %v2727_v2 = vld [vmem:[%s4143_s1] ss:$16 sps:$4 sm:$0xff]  }
   0x2   :  { %1628 = vmatprep.subr.bf16.mxu0 %v2723_v0  ;;  %v2728_v3 = vld [vmem:[%s4143_s1 + $0x8] ss:$16 sps:$4 sm:$0xff]   ;;  %1800 = vmatprep.subr.bf16.mxu1 %v2725_v1  ;;  %v2729_v4 = vld [vmem:[%s4143_s1 + $0x24] ss:$16 sps:$4 sm:$0xff]   ;;  %v2731_v5 = vld [vmem:[%s4143_s1 + $0x2c] ss:$16 sps:$4 sm:$0xff]  }
   0x3   :  { %1629 = vmatpush1.bf16.msra.mxu0 %v2727_v2  ;;  %1801 = vmatpush1.bf16.msra.mxu1 %v2728_v3  ;;  %v2733_v6 = vld [vmem:[%s4143_s1 + $0x20] ss:$16 sps:$4 sm:$0xff]   ;;  %v2734_v7 = vld [vmem:[%s4143_s1 + $0x28] ss:$16 sps:$4 sm:$0xff]   ;;  %v2735_v8 = vld [vmem:[%s4143_s1 + $0x44] ss:$16 sps:$4 sm:$0xff]  }
   0x4   :  { %1630 = vmatprep.subr.bf16.mxu0 %v2729_v4  ;;  %1802 = vmatprep.subr.bf16.mxu1 %v2731_v5  ;;  %v2737_v9 = vld [vmem:[%s4143_s1 + $0x4c] ss:$16 sps:$4 sm:$0xff]   ;;  %v2739_v10 = vld [vmem:[%s4143_s1 + $0x40] ss:$16 sps:$4 sm:$0xff]   ;;  %v2740_v11 = vld [vmem:[%s4143_s1 + $0x48] ss:$16 sps:$4 sm:$0xff]  }
   0x5   :  { %v2741_v12 = vld [vmem:[%s4143_s1 + $0x64] ss:$16 sps:$4 sm:$0xff]   ;;  %v2743_v13 = vld [vmem:[%s4143_s1 + $0x6c] ss:$16 sps:$4 sm:$0xff]   ;;  %v2745_v14 = vld [vmem:[%s4143_s1 + $0x60] ss:$16 sps:$4 sm:$0xff]  }
   0x6   :  { %v2746_v15 = vld [vmem:[%s4143_s1 + $0x68] ss:$16 sps:$4 sm:$0xff]   ;;  %v2747_v16 = vld [vmem:[%s4143_s1 + $0x84] ss:$16 sps:$4 sm:$0xff]   ;;  %v2749_v17 = vld [vmem:[%s4143_s1 + $0x8c] ss:$16 sps:$4 sm:$0xff]  }
   0x7   :  { %1631 = vmatpush1.bf16.msra.mxu0 %v2733_v6  ;;  %1803 = vmatpush1.bf16.msra.mxu1 %v2734_v7  ;;  %v2751_v18 = vld [vmem:[%s4143_s1 + $0x80] ss:$16 sps:$4 sm:$0xff]   ;;  %v2752_v19 = vld [vmem:[%s4143_s1 + $0x88] ss:$16 sps:$4 sm:$0xff]   ;;  %v2753_v20 = vld [vmem:[%s4143_s1 + $0xa4] ss:$16 sps:$4 sm:$0xff]  }
   0x8   :  { %1632 = vmatprep.subr.bf16.mxu0 %v2735_v8  ;;  %1804 = vmatprep.subr.bf16.mxu1 %v2737_v9  ;;  %v2755_v21 = vld [vmem:[%s4143_s1 + $0xac] ss:$16 sps:$4 sm:$0xff]   ;;  %v2757_v22 = vld [vmem:[%s4143_s1 + $0xa0] ss:$16 sps:$4 sm:$0xff]   ;;  %v2758_v23 = vld [vmem:[%s4143_s1 + $0xa8] ss:$16 sps:$4 sm:$0xff]  }
   0x9   :  { %v2759_v24 = vld [vmem:[%s4143_s1 + $0xc4] ss:$16 sps:$4 sm:$0xff]   ;;  %v2761_v25 = vld [vmem:[%s4143_s1 + $0xcc] ss:$16 sps:$4 sm:$0xff]   ;;  %v2763_v26 = vld [vmem:[%s4143_s1 + $0xc0] ss:$16 sps:$4 sm:$0xff]  }
   0xa   :  { %v2764_v27 = vld [vmem:[%s4143_s1 + $0xc8] ss:$16 sps:$4 sm:$0xff]   ;;  %v2765_v28 = vld [vmem:[%s4143_s1 + $0xe4] ss:$16 sps:$4 sm:$0xff]   ;;  %v2767_v29 = vld [vmem:[%s4143_s1 + $0xec] ss:$16 sps:$4 sm:$0xff]  }
   0xb   :  { %1633 = vmatpush1.bf16.msra.mxu0 %v2739_v10  ;;  %1805 = vmatpush1.bf16.msra.mxu1 %v2740_v11  ;;  %v2769_v30 = vld [vmem:[%s4143_s1 + $0xe0] ss:$16 sps:$4 sm:$0xff]   ;;  %v2770_v31 = vld [vmem:[%s4143_s1 + $0xe8] ss:$16 sps:$4 sm:$0xff]   ;;  %v2771_v32 = vld [vmem:[%s4143_s1 + $0x104] ss:$16 sps:$4 sm:$0xff]  }
   0xc   :  { %1634 = vmatprep.subr.bf16.mxu0 %v2741_v12  ;;  %1806 = vmatprep.subr.bf16.mxu1 %v2743_v13  ;;  %v2773_v33 = vld [vmem:[%s4143_s1 + $0x10c] ss:$16 sps:$4 sm:$0xff]   ;;  %v2775_v34 = vld [vmem:[%s4143_s1 + $0x100] ss:$16 sps:$4 sm:$0xff]   ;;  %v2776_v35 = vld [vmem:[%s4143_s1 + $0x108] ss:$16 sps:$4 sm:$0xff]  }
   0xd   :  { %v2777_v36 = vld [vmem:[%s4143_s1 + $0x124] ss:$16 sps:$4 sm:$0xff]   ;;  %v2779_v37 = vld [vmem:[%s4143_s1 + $0x12c] ss:$16 sps:$4 sm:$0xff]   ;;  %v2781_v38 = vld [vmem:[%s4143_s1 + $0x120] ss:$16 sps:$4 sm:$0xff]  }
   0xe   :  { %v2782_v39 = vld [vmem:[%s4143_s1 + $0x128] ss:$16 sps:$4 sm:$0xff]   ;;  %v2783_v40 = vld [vmem:[%s4143_s1 + $0x144] ss:$16 sps:$4 sm:$0xff]   ;;  %v2785_v41 = vld [vmem:[%s4143_s1 + $0x14c] ss:$16 sps:$4 sm:$0xff]  }
   0xf   :  { %1635 = vmatpush1.bf16.msra.mxu0 %v2745_v14  ;;  %1807 = vmatpush1.bf16.msra.mxu1 %v2746_v15  ;;  %v2787_v42 = vld [vmem:[%s4143_s1 + $0x140] ss:$16 sps:$4 sm:$0xff]   ;;  %v2788_v43 = vld [vmem:[%s4143_s1 + $0x148] ss:$16 sps:$4 sm:$0xff]   ;;  %v2789_v44 = vld [vmem:[%s4143_s1 + $0x164] ss:$16 sps:$4 sm:$0xff]  }
  0x10   :  { %1636 = vmatprep.subr.bf16.mxu0 %v2747_v16  ;;  %1808 = vmatprep.subr.bf16.mxu1 %v2749_v17  ;;  %v2791_v45 = vld [vmem:[%s4143_s1 + $0x16c] ss:$16 sps:$4 sm:$0xff]   ;;  %v22_v46 = vld [vmem:[%s4142_s0] sm:$0xff]  ;;  %v2794_v49 = vld [vmem:[%s4143_s1 + $0x168] ss:$16 sps:$4 sm:$0xff]  }
  0x11   :  { %v26_v47 = vld [vmem:[%s4142_s0 + $0x20] sm:$0xff]  ;;  %v2797_v52 = vld [vmem:[%s4143_s1 + $0x18c] ss:$16 sps:$4 sm:$0xff]   ;;  %v2800_v54 = vld [vmem:[%s4143_s1 + $0x188] ss:$16 sps:$4 sm:$0xff]  }
  0x12   :  { %v2793_v48 = vld [vmem:[%s4143_s1 + $0x160] ss:$16 sps:$4 sm:$0xff]   ;;  %v2348_v50 = vcombine.high %v22_v46, %v26_v47  ;;  %v2795_v51 = vld [vmem:[%s4143_s1 + $0x184] ss:$16 sps:$4 sm:$0xff]   ;;  %v2803_v56 = vld [vmem:[%s4143_s1 + $0x1ac] ss:$16 sps:$4 sm:$0xff]   ;;  %v2347_v5 = vcombine.low %v22_v46, %v26_v47 }
  0x13   :  { %1637 = vmatpush1.bf16.msra.mxu0 %v2751_v18  ;;  %1809 = vmatpush1.bf16.msra.mxu1 %v2752_v19  ;;  %v2799_v53 = vld [vmem:[%s4143_s1 + $0x180] ss:$16 sps:$4 sm:$0xff]   ;;  %v2801_v55 = vld [vmem:[%s4143_s1 + $0x1a4] ss:$16 sps:$4 sm:$0xff]   ;;  %v2806_v58 = vld [vmem:[%s4143_s1 + $0x1a8] ss:$16 sps:$4 sm:$0xff]  }
  0x14   :  { %1638 = vmatprep.subr.bf16.mxu0 %v2753_v20  ;;  %1810 = vmatprep.subr.bf16.mxu1 %v2755_v21  ;;  %v2805_v57 = vld [vmem:[%s4143_s1 + $0x1a0] ss:$16 sps:$4 sm:$0xff]   ;;  %v2807_v59 = vld [vmem:[%s4143_s1 + $0x1c4] ss:$16 sps:$4 sm:$0xff]   ;;  %v2809_v60 = vld [vmem:[%s4143_s1 + $0x1cc] ss:$16 sps:$4 sm:$0xff]  }
  0x15   :  { %1660 = vmatprep.mubr.bf16.mxu0 %v2348_v50  ;;  %1832 = vmatprep.mubr.bf16.mxu1 %v2348_v50  ;;  %v2811_v61 = vld [vmem:[%s4143_s1 + $0x1c0] ss:$16 sps:$4 sm:$0xff]   ;;  %v2812_v62 = vld [vmem:[%s4143_s1 + $0x1c8] ss:$16 sps:$4 sm:$0xff]   ;;  %v2813_v63 = vld [vmem:[%s4143_s1 + $0x1e4] ss:$16 sps:$4 sm:$0xff]  }
  0x16   :  { %v2815_v0 = vld [vmem:[%s4143_s1 + $0x1ec] ss:$16 sps:$4 sm:$0xff]   ;;  %v2817_v1 = vld [vmem:[%s4143_s1 + $0x1e0] ss:$16 sps:$4 sm:$0xff]   ;;  %v2818_v2 = vld [vmem:[%s4143_s1 + $0x1e8] ss:$16 sps:$4 sm:$0xff]  }
  0x17   :  { %1639 = vmatpush1.bf16.msra.mxu0 %v2757_v22  ;;  %1811 = vmatpush1.bf16.msra.mxu1 %v2758_v23  ;;  %v2821_v3 = vld [vmem:[%s4143_s1 + $0x204] ss:$16 sps:$4 sm:$0xff]   ;;  %v2824_v4 = vld [vmem:[%s4143_s1 + $0x20c] ss:$16 sps:$4 sm:$0xff]   ;;  %v2819_v6 = vld [vmem:[%s4143_s1 + $0x200] ss:$16 sps:$4 sm:$0xff]  }
  0x18   :  { %1640 = vmatprep.subr.bf16.mxu0 %v2759_v24  ;;  %1812 = vmatprep.subr.bf16.mxu1 %v2761_v25  ;;  %v2822_v7 = vld [vmem:[%s4143_s1 + $0x208] ss:$16 sps:$4 sm:$0xff]   ;;  %v2827_v8 = vld [vmem:[%s4143_s1 + $0x224] ss:$16 sps:$4 sm:$0xff]   ;;  %v2830_v9 = vld [vmem:[%s4143_s1 + $0x22c] ss:$16 sps:$4 sm:$0xff]  }
  0x19   :  { %v2825_v10 = vld [vmem:[%s4143_s1 + $0x220] ss:$16 sps:$4 sm:$0xff]   ;;  %v2828_v11 = vld [vmem:[%s4143_s1 + $0x228] ss:$16 sps:$4 sm:$0xff]   ;;  %v2833_v12 = vld [vmem:[%s4143_s1 + $0x244] ss:$16 sps:$4 sm:$0xff]  }
  0x1a   :  { %v2836_v13 = vld [vmem:[%s4143_s1 + $0x24c] ss:$16 sps:$4 sm:$0xff]   ;;  %v2831_v14 = vld [vmem:[%s4143_s1 + $0x240] ss:$16 sps:$4 sm:$0xff]   ;;  %v2834_v15 = vld [vmem:[%s4143_s1 + $0x248] ss:$16 sps:$4 sm:$0xff]  }
  0x1b   :  { %1641 = vmatpush1.bf16.msra.mxu0 %v2763_v26  ;;  %1813 = vmatpush1.bf16.msra.mxu1 %v2764_v27  ;;  %v2839_v16 = vld [vmem:[%s4143_s1 + $0x264] ss:$16 sps:$4 sm:$0xff]   ;;  %v2842_v17 = vld [vmem:[%s4143_s1 + $0x26c] ss:$16 sps:$4 sm:$0xff]   ;;  %v2837_v18 = vld [vmem:[%s4143_s1 + $0x260] ss:$16 sps:$4 sm:$0xff]  }
  0x1c   :  { %1642 = vmatprep.subr.bf16.mxu0 %v2765_v28  ;;  %1814 = vmatprep.subr.bf16.mxu1 %v2767_v29  ;;  %v2840_v19 = vld [vmem:[%s4143_s1 + $0x268] ss:$16 sps:$4 sm:$0xff]   ;;  %v2845_v20 = vld [vmem:[%s4143_s1 + $0x284] ss:$16 sps:$4 sm:$0xff]   ;;  %v2848_v21 = vld [vmem:[%s4143_s1 + $0x28c] ss:$16 sps:$4 sm:$0xff]  }
  0x1d   :  { %v2843_v22 = vld [vmem:[%s4143_s1 + $0x280] ss:$16 sps:$4 sm:$0xff]   ;;  %v2846_v23 = vld [vmem:[%s4143_s1 + $0x288] ss:$16 sps:$4 sm:$0xff]   ;;  %v2851_v24 = vld [vmem:[%s4143_s1 + $0x2a4] ss:$16 sps:$4 sm:$0xff]  }
  0x1e   :  { %v2854_v25 = vld [vmem:[%s4143_s1 + $0x2ac] ss:$16 sps:$4 sm:$0xff]   ;;  %v2849_v26 = vld [vmem:[%s4143_s1 + $0x2a0] ss:$16 sps:$4 sm:$0xff]   ;;  %v2852_v27 = vld [vmem:[%s4143_s1 + $0x2a8] ss:$16 sps:$4 sm:$0xff]  }
  0x1f   :  { %1643 = vmatpush1.bf16.msra.mxu0 %v2769_v30  ;;  %1815 = vmatpush1.bf16.msra.mxu1 %v2770_v31  ;;  %v2857_v28 = vld [vmem:[%s4143_s1 + $0x2c4] ss:$16 sps:$4 sm:$0xff]   ;;  %v2860_v29 = vld [vmem:[%s4143_s1 + $0x2cc] ss:$16 sps:$4 sm:$0xff]   ;;  %v2876_v46 = vld [vmem:[%s4143_s1 + $0x328] ss:$16 sps:$4 sm:$0xff]  }
  0x20   :  { %1644 = vmatprep.subr.bf16.mxu0 %v2771_v32  ;;  %1816 = vmatprep.subr.bf16.mxu1 %v2773_v33  ;;  %v3491_v30 = vld [vmem:[%s4142_s0 + $0x8] sm:$0xff]  ;;  %v2855_v32 = vld [vmem:[%s4143_s1 + $0x2c0] ss:$16 sps:$4 sm:$0xff]   ;;  %v2881_v47 = vld [vmem:[%s4143_s1 + $0x344] ss:$16 sps:$4 sm:$0xff]  }
  0x21   :  { %v3496_v31 = vld [vmem:[%s4142_s0 + $0x28] sm:$0xff] }
  0x22   :  { %v2858_v33 = vld [vmem:[%s4143_s1 + $0x2c8] ss:$16 sps:$4 sm:$0xff]  }
  0x23   :  { %1645 = vmatpush1.bf16.msra.mxu0 %v2775_v34  ;;  %1817 = vmatpush1.bf16.msra.mxu1 %v2776_v35  ;;  %v2350_v34 = vcombine.high %v3491_v30, %v3496_v31  ;;  %v2863_v35 = vld [vmem:[%s4143_s1 + $0x2e4] ss:$16 sps:$4 sm:$0xff]   ;;  %v2882_v50 = vld [vmem:[%s4143_s1 + $0x348] ss:$16 sps:$4 sm:$0xff]  }
  0x24   :  { %1646 = vmatprep.subr.bf16.mxu0 %v2777_v36  ;;  %1818 = vmatprep.subr.bf16.mxu1 %v2779_v37  ;;  %v2866_v36 = vld [vmem:[%s4143_s1 + $0x2ec] ss:$16 sps:$4 sm:$0xff]   ;;  %v2861_v37 = vld [vmem:[%s4143_s1 + $0x2e0] ss:$16 sps:$4 sm:$0xff]  }
  0x27   :  { %1647 = vmatpush1.bf16.msra.mxu0 %v2781_v38  ;;  %1819 = vmatpush1.bf16.msra.mxu1 %v2782_v39  ;;  %v2864_v38 = vld [vmem:[%s4143_s1 + $0x2e8] ss:$16 sps:$4 sm:$0xff]   ;;  %v2869_v39 = vld [vmem:[%s4143_s1 + $0x304] ss:$16 sps:$4 sm:$0xff]  }
  0x28   :  { %1648 = vmatprep.subr.bf16.mxu0 %v2783_v40  ;;  %1820 = vmatprep.subr.bf16.mxu1 %v2785_v41  ;;  %v2872_v40 = vld [vmem:[%s4143_s1 + $0x30c] ss:$16 sps:$4 sm:$0xff]   ;;  %v2867_v41 = vld [vmem:[%s4143_s1 + $0x300] ss:$16 sps:$4 sm:$0xff]  }
  0x2b   :  { %1649 = vmatpush1.bf16.msra.mxu0 %v2787_v42  ;;  %1821 = vmatpush1.bf16.msra.mxu1 %v2788_v43  ;;  %v2870_v42 = vld [vmem:[%s4143_s1 + $0x308] ss:$16 sps:$4 sm:$0xff]   ;;  %v2875_v43 = vld [vmem:[%s4143_s1 + $0x324] ss:$16 sps:$4 sm:$0xff]  }
  0x2c   :  { %1650 = vmatprep.subr.bf16.mxu0 %v2789_v44  ;;  %1822 = vmatprep.subr.bf16.mxu1 %v2791_v45  ;;  %v2878_v44 = vld [vmem:[%s4143_s1 + $0x32c] ss:$16 sps:$4 sm:$0xff]   ;;  %v2873_v45 = vld [vmem:[%s4143_s1 + $0x320] ss:$16 sps:$4 sm:$0xff]  }
  0x2f   :  { %1651 = vmatpush1.bf16.msra.mxu0 %v2793_v48  ;;  %1823 = vmatpush1.bf16.msra.mxu1 %v2794_v49  ;;  %v2884_v48 = vld [vmem:[%s4143_s1 + $0x34c] ss:$16 sps:$4 sm:$0xff]   ;;  %v2879_v49 = vld [vmem:[%s4143_s1 + $0x340] ss:$16 sps:$4 sm:$0xff]  }
  0x30   :  { %1652 = vmatprep.subr.bf16.mxu0 %v2795_v51  ;;  %1824 = vmatprep.subr.bf16.mxu1 %v2797_v52  ;;  %v2887_v51 = vld [vmem:[%s4143_s1 + $0x364] ss:$16 sps:$4 sm:$0xff]   ;;  %v2890_v52 = vld [vmem:[%s4143_s1 + $0x36c] ss:$16 sps:$4 sm:$0xff]  }
  0x33   :  { %1653 = vmatpush1.bf16.msra.mxu0 %v2799_v53  ;;  %1825 = vmatpush1.bf16.msra.mxu1 %v2800_v54  ;;  %v2885_v53 = vld [vmem:[%s4143_s1 + $0x360] ss:$16 sps:$4 sm:$0xff]   ;;  %v2888_v54 = vld [vmem:[%s4143_s1 + $0x368] ss:$16 sps:$4 sm:$0xff]  }
  0x34   :  { %1654 = vmatprep.subr.bf16.mxu0 %v2801_v55  ;;  %1826 = vmatprep.subr.bf16.mxu1 %v2803_v56  ;;  %v2893_v55 = vld [vmem:[%s4143_s1 + $0x384] ss:$16 sps:$4 sm:$0xff]   ;;  %v2896_v56 = vld [vmem:[%s4143_s1 + $0x38c] ss:$16 sps:$4 sm:$0xff]  }
  0x37   :  { %1655 = vmatpush1.bf16.msra.mxu0 %v2805_v57  ;;  %1827 = vmatpush1.bf16.msra.mxu1 %v2806_v58  ;;  %v2891_v57 = vld [vmem:[%s4143_s1 + $0x380] ss:$16 sps:$4 sm:$0xff]   ;;  %v2894_v58 = vld [vmem:[%s4143_s1 + $0x388] ss:$16 sps:$4 sm:$0xff]  }
  0x38   :  { %1656 = vmatprep.subr.bf16.mxu0 %v2807_v59  ;;  %1828 = vmatprep.subr.bf16.mxu1 %v2809_v60  ;;  %v2899_v59 = vld [vmem:[%s4143_s1 + $0x3a4] ss:$16 sps:$4 sm:$0xff]   ;;  %v2902_v60 = vld [vmem:[%s4143_s1 + $0x3ac] ss:$16 sps:$4 sm:$0xff]  }
  0x3b   :  { %1657 = vmatpush1.bf16.msra.mxu0 %v2811_v61  ;;  %1829 = vmatpush1.bf16.msra.mxu1 %v2812_v62  ;;  %v2897_v61 = vld [vmem:[%s4143_s1 + $0x3a0] ss:$16 sps:$4 sm:$0xff]   ;;  %v2900_v62 = vld [vmem:[%s4143_s1 + $0x3a8] ss:$16 sps:$4 sm:$0xff]  }
  0x3c   :  { %1658 = vmatprep.subr.bf16.mxu0 %v2813_v63  ;;  %1830 = vmatprep.subr.bf16.mxu1 %v2815_v0  ;;  %v2905_v63 = vld [vmem:[%s4143_s1 + $0x3c4] ss:$16 sps:$4 sm:$0xff]   ;;  %v2908_v0 = vld [vmem:[%s4143_s1 + $0x3cc] ss:$16 sps:$4 sm:$0xff]  }
  0x3f   :  { %1659 = vmatpush1.bf16.msra.mxu0 %v2817_v1  ;;  %1831 = vmatpush1.bf16.msra.mxu1 %v2818_v2  ;;  %v2903_v1 = vld [vmem:[%s4143_s1 + $0x3c0] ss:$16 sps:$4 sm:$0xff]   ;;  %v2906_v2 = vld [vmem:[%s4143_s1 + $0x3c8] ss:$16 sps:$4 sm:$0xff]  }
  0x40   :  { %1671 = vmatprep.subr.bf16.mxu0 %v2821_v3  ;;  %1843 = vmatprep.subr.bf16.mxu1 %v2824_v4  ;;  %v2911_v3 = vld [vmem:[%s4143_s1 + $0x3e4] ss:$16 sps:$4 sm:$0xff]   ;;  %v2914_v4 = vld [vmem:[%s4143_s1 + $0x3ec] ss:$16 sps:$4 sm:$0xff]  }
  0x42   :  { %1661 = vmatmul.mubr.bf16.vlgmr.msra.gmra.mrb[0].mxu0 %v2347_v5  ;;  %1833 = vmatmul.mubr.bf16.vlgmr.msra.gmra.mrb[0].mxu1 %v2347_v5  ;;  %v2909_v5 = vld [vmem:[%s4143_s1 + $0x3e0] ss:$16 sps:$4 sm:$0xff]  }
  0x43   :  { %1672 = vmatpush1.bf16.msra.mxu0 %v2819_v6  ;;  %1844 = vmatpush1.bf16.msra.mxu1 %v2822_v7  ;;  %v2912_v6 = vld [vmem:[%s4143_s1 + $0x3e8] ss:$16 sps:$4 sm:$0xff]   ;;  %v2917_v7 = vld [vmem:[%s4143_s1 + $0x404] ss:$16 sps:$4 sm:$0xff]  }
  0x44   :  { %1673 = vmatprep.subr.bf16.mxu0 %v2827_v8  ;;  %1845 = vmatprep.subr.bf16.mxu1 %v2830_v9  ;;  %v2920_v8 = vld [vmem:[%s4143_s1 + $0x40c] ss:$16 sps:$4 sm:$0xff]   ;;  %v2349_v9 = vcombine.low %v3491_v30, %v3496_v31  ;;  %v2942_v30 = vld [vmem:[%s4143_s1 + $0x488] ss:$16 sps:$4 sm:$0xff]   ;;  %v2947_v31 = vld [vmem:[%s4143_s1 + $0x4a4] ss:$16 sps:$4 sm:$0xff]  }
  0x45   :  { %1703 = vmatprep.mubr.bf16.mxu0 %v2350_v34  ;;  %1875 = vmatprep.mubr.bf16.mxu1 %v2350_v34  ;;  %v2948_v34 = vld [vmem:[%s4143_s1 + $0x4a8] ss:$16 sps:$4 sm:$0xff]  }
  0x47   :  { %1674 = vmatpush1.bf16.msra.mxu0 %v2825_v10  ;;  %1846 = vmatpush1.bf16.msra.mxu1 %v2828_v11  ;;  %v2915_v10 = vld [vmem:[%s4143_s1 + $0x400] ss:$16 sps:$4 sm:$0xff]   ;;  %v2918_v11 = vld [vmem:[%s4143_s1 + $0x408] ss:$16 sps:$4 sm:$0xff]  }
  0x48   :  { %1675 = vmatprep.subr.bf16.mxu0 %v2833_v12  ;;  %1847 = vmatprep.subr.bf16.mxu1 %v2836_v13  ;;  %v2923_v12 = vld [vmem:[%s4143_s1 + $0x424] ss:$16 sps:$4 sm:$0xff]   ;;  %v2926_v13 = vld [vmem:[%s4143_s1 + $0x42c] ss:$16 sps:$4 sm:$0xff]  }
  0x4b   :  { %1676 = vmatpush1.bf16.msra.mxu0 %v2831_v14  ;;  %1848 = vmatpush1.bf16.msra.mxu1 %v2834_v15  ;;  %v3637_v14 = vld [vmem:[%s4142_s0 + $0x10] sm:$0xff] }
  0x4c   :  { %1677 = vmatprep.subr.bf16.mxu0 %v2839_v16  ;;  %1849 = vmatprep.subr.bf16.mxu1 %v2842_v17  ;;  %v3642_v15 = vld [vmem:[%s4142_s0 + $0x30] sm:$0xff] }
  0x4d   :  { %v2352_v16 = vcombine.high %v3637_v14, %v3642_v15  ;;  %v2921_v17 = vld [vmem:[%s4143_s1 + $0x420] ss:$16 sps:$4 sm:$0xff]  }
  0x4f   :  { %1678 = vmatpush1.bf16.msra.mxu0 %v2837_v18  ;;  %1850 = vmatpush1.bf16.msra.mxu1 %v2840_v19  ;;  %v2924_v18 = vld [vmem:[%s4143_s1 + $0x428] ss:$16 sps:$4 sm:$0xff]   ;;  %v2929_v19 = vld [vmem:[%s4143_s1 + $0x444] ss:$16 sps:$4 sm:$0xff]  }
  0x50   :  { %1679 = vmatprep.subr.bf16.mxu0 %v2845_v20  ;;  %1851 = vmatprep.subr.bf16.mxu1 %v2848_v21  ;;  %v2932_v20 = vld [vmem:[%s4143_s1 + $0x44c] ss:$16 sps:$4 sm:$0xff]   ;;  %v2927_v21 = vld [vmem:[%s4143_s1 + $0x440] ss:$16 sps:$4 sm:$0xff]  }
  0x53   :  { %1680 = vmatpush1.bf16.msra.mxu0 %v2843_v22  ;;  %1852 = vmatpush1.bf16.msra.mxu1 %v2846_v23  ;;  %v2930_v22 = vld [vmem:[%s4143_s1 + $0x448] ss:$16 sps:$4 sm:$0xff]   ;;  %v2935_v23 = vld [vmem:[%s4143_s1 + $0x464] ss:$16 sps:$4 sm:$0xff]  }
  0x54   :  { %1681 = vmatprep.subr.bf16.mxu0 %v2851_v24  ;;  %1853 = vmatprep.subr.bf16.mxu1 %v2854_v25  ;;  %v2938_v24 = vld [vmem:[%s4143_s1 + $0x46c] ss:$16 sps:$4 sm:$0xff]   ;;  %v2933_v25 = vld [vmem:[%s4143_s1 + $0x460] ss:$16 sps:$4 sm:$0xff]  }
  0x57   :  { %1682 = vmatpush1.bf16.msra.mxu0 %v2849_v26  ;;  %1854 = vmatpush1.bf16.msra.mxu1 %v2852_v27  ;;  %v2936_v26 = vld [vmem:[%s4143_s1 + $0x468] ss:$16 sps:$4 sm:$0xff]   ;;  %v2941_v27 = vld [vmem:[%s4143_s1 + $0x484] ss:$16 sps:$4 sm:$0xff]  }
  0x58   :  { %1683 = vmatprep.subr.bf16.mxu0 %v2857_v28  ;;  %1855 = vmatprep.subr.bf16.mxu1 %v2860_v29  ;;  %v2944_v28 = vld [vmem:[%s4143_s1 + $0x48c] ss:$16 sps:$4 sm:$0xff]   ;;  %v2939_v29 = vld [vmem:[%s4143_s1 + $0x480] ss:$16 sps:$4 sm:$0xff]  }
  0x5b   :  { %1684 = vmatpush1.bf16.msra.mxu0 %v2855_v32  ;;  %1856 = vmatpush1.bf16.msra.mxu1 %v2858_v33  ;;  %v2950_v32 = vld [vmem:[%s4143_s1 + $0x4ac] ss:$16 sps:$4 sm:$0xff]   ;;  %v2945_v33 = vld [vmem:[%s4143_s1 + $0x4a0] ss:$16 sps:$4 sm:$0xff]  }
  0x5c   :  { %1685 = vmatprep.subr.bf16.mxu0 %v2863_v35  ;;  %1857 = vmatprep.subr.bf16.mxu1 %v2866_v36  ;;  %v2953_v35 = vld [vmem:[%s4143_s1 + $0x4c4] ss:$16 sps:$4 sm:$0xff]   ;;  %v2956_v36 = vld [vmem:[%s4143_s1 + $0x4cc] ss:$16 sps:$4 sm:$0xff]  }
  0x5f   :  { %1686 = vmatpush1.bf16.msra.mxu0 %v2861_v37  ;;  %1858 = vmatpush1.bf16.msra.mxu1 %v2864_v38  ;;  %v2951_v37 = vld [vmem:[%s4143_s1 + $0x4c0] ss:$16 sps:$4 sm:$0xff]   ;;  %v2954_v38 = vld [vmem:[%s4143_s1 + $0x4c8] ss:$16 sps:$4 sm:$0xff]  }
  0x60   :  { %1687 = vmatprep.subr.bf16.mxu0 %v2869_v39  ;;  %1859 = vmatprep.subr.bf16.mxu1 %v2872_v40  ;;  %v2959_v39 = vld [vmem:[%s4143_s1 + $0x4e4] ss:$16 sps:$4 sm:$0xff]   ;;  %v2962_v40 = vld [vmem:[%s4143_s1 + $0x4ec] ss:$16 sps:$4 sm:$0xff]  }
  0x63   :  { %1688 = vmatpush1.bf16.msra.mxu0 %v2867_v41  ;;  %1860 = vmatpush1.bf16.msra.mxu1 %v2870_v42  ;;  %v2957_v41 = vld [vmem:[%s4143_s1 + $0x4e0] ss:$16 sps:$4 sm:$0xff]   ;;  %v2960_v42 = vld [vmem:[%s4143_s1 + $0x4e8] ss:$16 sps:$4 sm:$0xff]  }
  0x64   :  { %1689 = vmatprep.subr.bf16.mxu0 %v2875_v43  ;;  %1861 = vmatprep.subr.bf16.mxu1 %v2878_v44  ;;  %v2965_v43 = vld [vmem:[%s4143_s1 + $0x504] ss:$16 sps:$4 sm:$0xff]   ;;  %v2968_v44 = vld [vmem:[%s4143_s1 + $0x50c] ss:$16 sps:$4 sm:$0xff]  }
  0x67   :  { %1690 = vmatpush1.bf16.msra.mxu0 %v2873_v45  ;;  %1862 = vmatpush1.bf16.msra.mxu1 %v2876_v46  ;;  %v2963_v45 = vld [vmem:[%s4143_s1 + $0x500] ss:$16 sps:$4 sm:$0xff]   ;;  %v2966_v46 = vld [vmem:[%s4143_s1 + $0x508] ss:$16 sps:$4 sm:$0xff]  }
  0x68   :  { %1691 = vmatprep.subr.bf16.mxu0 %v2881_v47  ;;  %1863 = vmatprep.subr.bf16.mxu1 %v2884_v48  ;;  %v2971_v47 = vld [vmem:[%s4143_s1 + $0x524] ss:$16 sps:$4 sm:$0xff]   ;;  %v2974_v48 = vld [vmem:[%s4143_s1 + $0x52c] ss:$16 sps:$4 sm:$0xff]  }
  0x6b   :  { %1692 = vmatpush1.bf16.msra.mxu0 %v2879_v49  ;;  %1864 = vmatpush1.bf16.msra.mxu1 %v2882_v50  ;;  %v2969_v49 = vld [vmem:[%s4143_s1 + $0x520] ss:$16 sps:$4 sm:$0xff]   ;;  %v2972_v50 = vld [vmem:[%s4143_s1 + $0x528] ss:$16 sps:$4 sm:$0xff]  }
  0x6c   :  { %1693 = vmatprep.subr.bf16.mxu0 %v2887_v51  ;;  %1865 = vmatprep.subr.bf16.mxu1 %v2890_v52  ;;  %v2977_v51 = vld [vmem:[%s4143_s1 + $0x544] ss:$16 sps:$4 sm:$0xff]   ;;  %v2980_v52 = vld [vmem:[%s4143_s1 + $0x54c] ss:$16 sps:$4 sm:$0xff]  }
  0x6f   :  { %1694 = vmatpush1.bf16.msra.mxu0 %v2885_v53  ;;  %1866 = vmatpush1.bf16.msra.mxu1 %v2888_v54  ;;  %v2975_v53 = vld [vmem:[%s4143_s1 + $0x540] ss:$16 sps:$4 sm:$0xff]   ;;  %v2978_v54 = vld [vmem:[%s4143_s1 + $0x548] ss:$16 sps:$4 sm:$0xff]  }
  0x70   :  { %1695 = vmatprep.subr.bf16.mxu0 %v2893_v55  ;;  %1867 = vmatprep.subr.bf16.mxu1 %v2896_v56  ;;  %v2983_v55 = vld [vmem:[%s4143_s1 + $0x564] ss:$16 sps:$4 sm:$0xff]   ;;  %v2986_v56 = vld [vmem:[%s4143_s1 + $0x56c] ss:$16 sps:$4 sm:$0xff]  }
  0x73   :  { %1696 = vmatpush1.bf16.msra.mxu0 %v2891_v57  ;;  %1868 = vmatpush1.bf16.msra.mxu1 %v2894_v58  ;;  %v2981_v57 = vld [vmem:[%s4143_s1 + $0x560] ss:$16 sps:$4 sm:$0xff]   ;;  %v2984_v58 = vld [vmem:[%s4143_s1 + $0x568] ss:$16 sps:$4 sm:$0xff]  }
  0x74   :  { %1697 = vmatprep.subr.bf16.mxu0 %v2899_v59  ;;  %1869 = vmatprep.subr.bf16.mxu1 %v2902_v60  ;;  %v2989_v59 = vld [vmem:[%s4143_s1 + $0x584] ss:$16 sps:$4 sm:$0xff]   ;;  %v2992_v60 = vld [vmem:[%s4143_s1 + $0x58c] ss:$16 sps:$4 sm:$0xff]  }
  0x77   :  { %1698 = vmatpush1.bf16.msra.mxu0 %v2897_v61  ;;  %1870 = vmatpush1.bf16.msra.mxu1 %v2900_v62  ;;  %v2987_v61 = vld [vmem:[%s4143_s1 + $0x580] ss:$16 sps:$4 sm:$0xff]   ;;  %v2990_v62 = vld [vmem:[%s4143_s1 + $0x588] ss:$16 sps:$4 sm:$0xff]  }
  0x78   :  { %1699 = vmatprep.subr.bf16.mxu0 %v2905_v63  ;;  %1871 = vmatprep.subr.bf16.mxu1 %v2908_v0  ;;  %v2995_v63 = vld [vmem:[%s4143_s1 + $0x5a4] ss:$16 sps:$4 sm:$0xff]   ;;  %v2998_v0 = vld [vmem:[%s4143_s1 + $0x5ac] ss:$16 sps:$4 sm:$0xff]  }
  0x7b   :  { %1700 = vmatpush1.bf16.msra.mxu0 %v2903_v1  ;;  %1872 = vmatpush1.bf16.msra.mxu1 %v2906_v2  ;;  %v2993_v1 = vld [vmem:[%s4143_s1 + $0x5a0] ss:$16 sps:$4 sm:$0xff]   ;;  %v2996_v2 = vld [vmem:[%s4143_s1 + $0x5a8] ss:$16 sps:$4 sm:$0xff]  }
  0x7c   :  { %1701 = vmatprep.subr.bf16.mxu0 %v2911_v3  ;;  %1873 = vmatprep.subr.bf16.mxu1 %v2914_v4  ;;  %v3001_v3 = vld [vmem:[%s4143_s1 + $0x5c4] ss:$16 sps:$4 sm:$0xff]   ;;  %v3004_v4 = vld [vmem:[%s4143_s1 + $0x5cc] ss:$16 sps:$4 sm:$0xff]  }
  0x7f   :  { %1702 = vmatpush1.bf16.msra.mxu0 %v2909_v5  ;;  %1874 = vmatpush1.bf16.msra.mxu1 %v2912_v6  ;;  %v2999_v5 = vld [vmem:[%s4143_s1 + $0x5c0] ss:$16 sps:$4 sm:$0xff]   ;;  %v3002_v6 = vld [vmem:[%s4143_s1 + $0x5c8] ss:$16 sps:$4 sm:$0xff]  }
  0x80   :  { %1714 = vmatprep.subr.bf16.mxu0 %v2917_v7  ;;  %1886 = vmatprep.subr.bf16.mxu1 %v2920_v8  ;;  %v3007_v7 = vld [vmem:[%s4143_s1 + $0x5e4] ss:$16 sps:$4 sm:$0xff]   ;;  %v3010_v8 = vld [vmem:[%s4143_s1 + $0x5ec] ss:$16 sps:$4 sm:$0xff]  }
  0x82   :  { %1704 = vmatmul.mubr.bf16.vlgmr.msra.gmra.mrb[0].mxu0 %v2349_v9  ;;  %1876 = vmatmul.mubr.bf16.vlgmr.msra.gmra.mrb[0].mxu1 %v2349_v9  ;;  %v3005_v9 = vld [vmem:[%s4143_s1 + $0x5e0] ss:$16 sps:$4 sm:$0xff]  }
  0x83   :  { %1715 = vmatpush1.bf16.msra.mxu0 %v2915_v10  ;;  %1887 = vmatpush1.bf16.msra.mxu1 %v2918_v11  ;;  %v3008_v10 = vld [vmem:[%s4143_s1 + $0x5e8] ss:$16 sps:$4 sm:$0xff]   ;;  %v3013_v11 = vld [vmem:[%s4143_s1 + $0x604] ss:$16 sps:$4 sm:$0xff]  }
  0x84   :  { %1716 = vmatprep.subr.bf16.mxu0 %v2923_v12  ;;  %1888 = vmatprep.subr.bf16.mxu1 %v2926_v13  ;;  %v3016_v12 = vld [vmem:[%s4143_s1 + $0x60c] ss:$16 sps:$4 sm:$0xff]  }
  0x85   :  { %1746 = vmatprep.mubr.bf16.mxu0 %v2352_v16  ;;  %1918 = vmatprep.mubr.bf16.mxu1 %v2352_v16  ;;  %v3829_v13 = vld [vmem:[%s4142_s0 + $0x18] sm:$0xff] }
  0x86   :  { %v3834_v16 = vld [vmem:[%s4142_s0 + $0x38] sm:$0xff] }
  0x87   :  { %1717 = vmatpush1.bf16.msra.mxu0 %v2921_v17  ;;  %1889 = vmatpush1.bf16.msra.mxu1 %v2924_v18  ;;  %v3011_v17 = vld [vmem:[%s4143_s1 + $0x600] ss:$16 sps:$4 sm:$0xff]   ;;  %v3014_v18 = vld [vmem:[%s4143_s1 + $0x608] ss:$16 sps:$4 sm:$0xff]  }
  0x88   :  { %1718 = vmatprep.subr.bf16.mxu0 %v2929_v19  ;;  %1890 = vmatprep.subr.bf16.mxu1 %v2932_v20  ;;  %v2351_v19 = vcombine.low %v3637_v14, %v3642_v15  ;;  %v3019_v20 = vld [vmem:[%s4143_s1 + $0x624] ss:$16 sps:$4 sm:$0xff]   ;;  %v3020_v14 = vld [vmem:[%s4143_s1 + $0x628] ss:$16 sps:$4 sm:$0xff]   ;;  %v2354_v15 = vcombine.high %v3829_v13, %v3834_v16 }
  0x8b   :  { %1719 = vmatpush1.bf16.msra.mxu0 %v2927_v21  ;;  %1891 = vmatpush1.bf16.msra.mxu1 %v2930_v22  ;;  %v3022_v21 = vld [vmem:[%s4143_s1 + $0x62c] ss:$16 sps:$4 sm:$0xff]   ;;  %v3017_v22 = vld [vmem:[%s4143_s1 + $0x620] ss:$16 sps:$4 sm:$0xff]  }
  0x8c   :  { %1720 = vmatprep.subr.bf16.mxu0 %v2935_v23  ;;  %1892 = vmatprep.subr.bf16.mxu1 %v2938_v24  ;;  %v3025_v23 = vld [vmem:[%s4143_s1 + $0x644] ss:$16 sps:$4 sm:$0xff]   ;;  %v3028_v24 = vld [vmem:[%s4143_s1 + $0x64c] ss:$16 sps:$4 sm:$0xff]  }
  0x8f   :  { %1721 = vmatpush1.bf16.msra.mxu0 %v2933_v25  ;;  %1893 = vmatpush1.bf16.msra.mxu1 %v2936_v26 }
  0x90   :  { %1722 = vmatprep.subr.bf16.mxu0 %v2941_v27  ;;  %1894 = vmatprep.subr.bf16.mxu1 %v2944_v28 }
  0x93   :  { %1723 = vmatpush1.bf16.msra.mxu0 %v2939_v29  ;;  %1895 = vmatpush1.bf16.msra.mxu1 %v2942_v30 }
  0x94   :  { %1724 = vmatprep.subr.bf16.mxu0 %v2947_v31  ;;  %1896 = vmatprep.subr.bf16.mxu1 %v2950_v32 }
  0x97   :  { %1725 = vmatpush1.bf16.msra.mxu0 %v2945_v33  ;;  %1897 = vmatpush1.bf16.msra.mxu1 %v2948_v34 }
  0x98   :  { %1726 = vmatprep.subr.bf16.mxu0 %v2953_v35  ;;  %1898 = vmatprep.subr.bf16.mxu1 %v2956_v36 }
  0x9b   :  { %1727 = vmatpush1.bf16.msra.mxu0 %v2951_v37  ;;  %1899 = vmatpush1.bf16.msra.mxu1 %v2954_v38 }
  0x9c   :  { %1728 = vmatprep.subr.bf16.mxu0 %v2959_v39  ;;  %1900 = vmatprep.subr.bf16.mxu1 %v2962_v40 }
  0x9f   :  { %1729 = vmatpush1.bf16.msra.mxu0 %v2957_v41  ;;  %1901 = vmatpush1.bf16.msra.mxu1 %v2960_v42 }
  0xa0   :  { %1730 = vmatprep.subr.bf16.mxu0 %v2965_v43  ;;  %1902 = vmatprep.subr.bf16.mxu1 %v2968_v44 }
  0xa3   :  { %1731 = vmatpush1.bf16.msra.mxu0 %v2963_v45  ;;  %1903 = vmatpush1.bf16.msra.mxu1 %v2966_v46 }
  0xa4   :  { %1732 = vmatprep.subr.bf16.mxu0 %v2971_v47  ;;  %1904 = vmatprep.subr.bf16.mxu1 %v2974_v48 }
  0xa7   :  { %1733 = vmatpush1.bf16.msra.mxu0 %v2969_v49  ;;  %1905 = vmatpush1.bf16.msra.mxu1 %v2972_v50 }
  0xa8   :  { %1734 = vmatprep.subr.bf16.mxu0 %v2977_v51  ;;  %1906 = vmatprep.subr.bf16.mxu1 %v2980_v52 }
  0xab   :  { %1735 = vmatpush1.bf16.msra.mxu0 %v2975_v53  ;;  %1907 = vmatpush1.bf16.msra.mxu1 %v2978_v54 }
  0xac   :  { %1736 = vmatprep.subr.bf16.mxu0 %v2983_v55  ;;  %1908 = vmatprep.subr.bf16.mxu1 %v2986_v56 }
  0xaf   :  { %1737 = vmatpush1.bf16.msra.mxu0 %v2981_v57  ;;  %1909 = vmatpush1.bf16.msra.mxu1 %v2984_v58 }
  0xb0   :  { %1738 = vmatprep.subr.bf16.mxu0 %v2989_v59  ;;  %1910 = vmatprep.subr.bf16.mxu1 %v2992_v60 }
  0xb3   :  { %1739 = vmatpush1.bf16.msra.mxu0 %v2987_v61  ;;  %1911 = vmatpush1.bf16.msra.mxu1 %v2990_v62 }
  0xb4   :  { %1740 = vmatprep.subr.bf16.mxu0 %v2995_v63  ;;  %1912 = vmatprep.subr.bf16.mxu1 %v2998_v0 }
  0xb7   :  { %1741 = vmatpush1.bf16.msra.mxu0 %v2993_v1  ;;  %1913 = vmatpush1.bf16.msra.mxu1 %v2996_v2 }
  0xb8   :  { %1742 = vmatprep.subr.bf16.mxu0 %v3001_v3  ;;  %1914 = vmatprep.subr.bf16.mxu1 %v3004_v4 }
  0xbb   :  { %1743 = vmatpush1.bf16.msra.mxu0 %v2999_v5  ;;  %1915 = vmatpush1.bf16.msra.mxu1 %v3002_v6 }
  0xbc   :  { %1744 = vmatprep.subr.bf16.mxu0 %v3007_v7  ;;  %1916 = vmatprep.subr.bf16.mxu1 %v3010_v8 }
  0xbf   :  { %1745 = vmatpush1.bf16.msra.mxu0 %v3005_v9  ;;  %1917 = vmatpush1.bf16.msra.mxu1 %v3008_v10 }
  0xc0   :  { %1757 = vmatprep.subr.bf16.mxu0 %v3013_v11  ;;  %1929 = vmatprep.subr.bf16.mxu1 %v3016_v12 }
  0xc2   :  { %1747 = vmatmul.mubr.bf16.vlgmr.msra.gmra.mrb[0].mxu0 %v2351_v19  ;;  %1919 = vmatmul.mubr.bf16.vlgmr.msra.gmra.mrb[0].mxu1 %v2351_v19 }
  0xc3   :  { %1758 = vmatpush1.bf16.msra.mxu0 %v3011_v17  ;;  %1930 = vmatpush1.bf16.msra.mxu1 %v3014_v18 }
  0xc4   :  { %1759 = vmatprep.subr.bf16.mxu0 %v3019_v20  ;;  %1931 = vmatprep.subr.bf16.mxu1 %v3022_v21 }
  0xc5   :  { %1789 = vmatprep.mubr.bf16.mxu0 %v2354_v15  ;;  %1961 = vmatprep.mubr.bf16.mxu1 %v2354_v15 }
  0xc6   :  { %10 = vsyncpa [#allocation3], 0  ;;  %v3023_v25 = vld [vmem:[%s4143_s1 + $0x640] ss:$16 sps:$4 sm:$0xff]   ;;  %v3026_v26 = vld [vmem:[%s4143_s1 + $0x648] ss:$16 sps:$4 sm:$0xff]   ;;  %v2353_v21 = vcombine.low %v3829_v13, %v3834_v16 }
  0xc7   :  { %1760 = vmatpush1.bf16.msra.mxu0 %v3017_v22  ;;  %1932 = vmatpush1.bf16.msra.mxu1 %v3020_v14  ;;  %v3031_v27 = vld [vmem:[%s4143_s1 + $0x664] ss:$16 sps:$4 sm:$0xff]   ;;  %v3034_v28 = vld [vmem:[%s4143_s1 + $0x66c] ss:$16 sps:$4 sm:$0xff]   ;;  %v3029_v29 = vld [vmem:[%s4143_s1 + $0x660] ss:$16 sps:$4 sm:$0xff]  }
  0xc8   :  { %1761 = vmatprep.subr.bf16.mxu0 %v3025_v23  ;;  %1933 = vmatprep.subr.bf16.mxu1 %v3028_v24  ;;  %v3032_v30 = vld [vmem:[%s4143_s1 + $0x668] ss:$16 sps:$4 sm:$0xff]   ;;  %v3037_v31 = vld [vmem:[%s4143_s1 + $0x684] ss:$16 sps:$4 sm:$0xff]   ;;  %v3040_v32 = vld [vmem:[%s4143_s1 + $0x68c] ss:$16 sps:$4 sm:$0xff]  }
  0xc9   :  { %v3035_v33 = vld [vmem:[%s4143_s1 + $0x680] ss:$16 sps:$4 sm:$0xff]   ;;  %v3038_v34 = vld [vmem:[%s4143_s1 + $0x688] ss:$16 sps:$4 sm:$0xff]   ;;  %v3043_v35 = vld [vmem:[%s4143_s1 + $0x6a4] ss:$16 sps:$4 sm:$0xff]  }
  0xca   :  { %v3046_v36 = vld [vmem:[%s4143_s1 + $0x6ac] ss:$16 sps:$4 sm:$0xff]   ;;  %v3041_v37 = vld [vmem:[%s4143_s1 + $0x6a0] ss:$16 sps:$4 sm:$0xff]   ;;  %v3044_v38 = vld [vmem:[%s4143_s1 + $0x6a8] ss:$16 sps:$4 sm:$0xff]  }
  0xcb   :  { %1762 = vmatpush1.bf16.msra.mxu0 %v3023_v25  ;;  %1934 = vmatpush1.bf16.msra.mxu1 %v3026_v26  ;;  %v3049_v39 = vld [vmem:[%s4143_s1 + $0x6c4] ss:$16 sps:$4 sm:$0xff]   ;;  %v3052_v40 = vld [vmem:[%s4143_s1 + $0x6cc] ss:$16 sps:$4 sm:$0xff]   ;;  %v3047_v41 = vld [vmem:[%s4143_s1 + $0x6c0] ss:$16 sps:$4 sm:$0xff]  }
  0xcc   :  { %1763 = vmatprep.subr.bf16.mxu0 %v3031_v27  ;;  %1935 = vmatprep.subr.bf16.mxu1 %v3034_v28  ;;  %v3050_v42 = vld [vmem:[%s4143_s1 + $0x6c8] ss:$16 sps:$4 sm:$0xff]   ;;  %v3055_v43 = vld [vmem:[%s4143_s1 + $0x6e4] ss:$16 sps:$4 sm:$0xff]   ;;  %v3058_v44 = vld [vmem:[%s4143_s1 + $0x6ec] ss:$16 sps:$4 sm:$0xff]  }
  0xcd   :  { %v3053_v45 = vld [vmem:[%s4143_s1 + $0x6e0] ss:$16 sps:$4 sm:$0xff]   ;;  %v3056_v46 = vld [vmem:[%s4143_s1 + $0x6e8] ss:$16 sps:$4 sm:$0xff]   ;;  %v3061_v47 = vld [vmem:[%s4143_s1 + $0x704] ss:$16 sps:$4 sm:$0xff]  }
  0xce   :  { %v3064_v48 = vld [vmem:[%s4143_s1 + $0x70c] ss:$16 sps:$4 sm:$0xff]   ;;  %v3059_v49 = vld [vmem:[%s4143_s1 + $0x700] ss:$16 sps:$4 sm:$0xff]   ;;  %v3062_v50 = vld [vmem:[%s4143_s1 + $0x708] ss:$16 sps:$4 sm:$0xff]  }
  0xcf   :  { %1764 = vmatpush1.bf16.msra.mxu0 %v3029_v29  ;;  %1936 = vmatpush1.bf16.msra.mxu1 %v3032_v30  ;;  %v3067_v51 = vld [vmem:[%s4143_s1 + $0x724] ss:$16 sps:$4 sm:$0xff]   ;;  %v3070_v52 = vld [vmem:[%s4143_s1 + $0x72c] ss:$16 sps:$4 sm:$0xff]   ;;  %v3065_v53 = vld [vmem:[%s4143_s1 + $0x720] ss:$16 sps:$4 sm:$0xff]  }
  0xd0   :  { %1765 = vmatprep.subr.bf16.mxu0 %v3037_v31  ;;  %1937 = vmatprep.subr.bf16.mxu1 %v3040_v32  ;;  %v3068_v54 = vld [vmem:[%s4143_s1 + $0x728] ss:$16 sps:$4 sm:$0xff]   ;;  %v3073_v55 = vld [vmem:[%s4143_s1 + $0x744] ss:$16 sps:$4 sm:$0xff]   ;;  %v3076_v56 = vld [vmem:[%s4143_s1 + $0x74c] ss:$16 sps:$4 sm:$0xff]  }
  0xd1   :  { %v3071_v57 = vld [vmem:[%s4143_s1 + $0x740] ss:$16 sps:$4 sm:$0xff]   ;;  %v3074_v58 = vld [vmem:[%s4143_s1 + $0x748] ss:$16 sps:$4 sm:$0xff]   ;;  %v3079_v59 = vld [vmem:[%s4143_s1 + $0x764] ss:$16 sps:$4 sm:$0xff]  }
  0xd2   :  { %v3082_v60 = vld [vmem:[%s4143_s1 + $0x76c] ss:$16 sps:$4 sm:$0xff]   ;;  %v3077_v61 = vld [vmem:[%s4143_s1 + $0x760] ss:$16 sps:$4 sm:$0xff]   ;;  %v3080_v62 = vld [vmem:[%s4143_s1 + $0x768] ss:$16 sps:$4 sm:$0xff]  }
  0xd3   :  { %1766 = vmatpush1.bf16.msra.mxu0 %v3035_v33  ;;  %1938 = vmatpush1.bf16.msra.mxu1 %v3038_v34  ;;  %v3085_v63 = vld [vmem:[%s4143_s1 + $0x784] ss:$16 sps:$4 sm:$0xff]   ;;  %v3088_v0 = vld [vmem:[%s4143_s1 + $0x78c] ss:$16 sps:$4 sm:$0xff]   ;;  %v3083_v1 = vld [vmem:[%s4143_s1 + $0x780] ss:$16 sps:$4 sm:$0xff]  }
  0xd4   :  { %1767 = vmatprep.subr.bf16.mxu0 %v3043_v35  ;;  %1939 = vmatprep.subr.bf16.mxu1 %v3046_v36  ;;  %v3086_v2 = vld [vmem:[%s4143_s1 + $0x788] ss:$16 sps:$4 sm:$0xff]   ;;  %v3091_v3 = vld [vmem:[%s4143_s1 + $0x7a4] ss:$16 sps:$4 sm:$0xff]   ;;  %v3094_v4 = vld [vmem:[%s4143_s1 + $0x7ac] ss:$16 sps:$4 sm:$0xff]  }
  0xd5   :  { %v3089_v5 = vld [vmem:[%s4143_s1 + $0x7a0] ss:$16 sps:$4 sm:$0xff]   ;;  %v3092_v6 = vld [vmem:[%s4143_s1 + $0x7a8] ss:$16 sps:$4 sm:$0xff]   ;;  %v3097_v7 = vld [vmem:[%s4143_s1 + $0x7c4] ss:$16 sps:$4 sm:$0xff]  }
  0xd6   :  { %v3100_v8 = vld [vmem:[%s4143_s1 + $0x7cc] ss:$16 sps:$4 sm:$0xff]   ;;  %v3095_v9 = vld [vmem:[%s4143_s1 + $0x7c0] ss:$16 sps:$4 sm:$0xff]   ;;  %v3098_v10 = vld [vmem:[%s4143_s1 + $0x7c8] ss:$16 sps:$4 sm:$0xff]  }
  0xd7   :  { %1768 = vmatpush1.bf16.msra.mxu0 %v3041_v37  ;;  %1940 = vmatpush1.bf16.msra.mxu1 %v3044_v38  ;;  %v3103_v11 = vld [vmem:[%s4143_s1 + $0x7e4] ss:$16 sps:$4 sm:$0xff]   ;;  %v3106_v12 = vld [vmem:[%s4143_s1 + $0x7ec] ss:$16 sps:$4 sm:$0xff]   ;;  %v3101_v17 = vld [vmem:[%s4143_s1 + $0x7e0] ss:$16 sps:$4 sm:$0xff]  }
  0xd8   :  { %1769 = vmatprep.subr.bf16.mxu0 %v3049_v39  ;;  %1941 = vmatprep.subr.bf16.mxu1 %v3052_v40  ;;  %v3104_v18 = vld [vmem:[%s4143_s1 + $0x7e8] ss:$16 sps:$4 sm:$0xff]   ;;  %v3107_v19 = vld [vmem:[%s4145_s3 + $0x40] sm:$0xff]   ;;  %v3115_v24 = vld [vmem:[%s4145_s3 + $0x50] sm:$0xff]   ;;  %s3179_s27 = smov [#allocation2]  }
  0xd9   :  { %v3108_v20 = vld [vmem:[%s4145_s3 + $0xc0] sm:$0xff]   ;;  %v3111_v15 = vld [vmem:[%s4145_s3 + $0x48] sm:$0xff]   ;;  %v3116_v25 = vld [vmem:[%s4145_s3 + $0xd0] sm:$0xff]   ;;  %s2336_s28 = sshll.u32 %s3179_s27, 4  ;;  %s2337_s28 = int_to_ptr.vmem [resolvable:$true] %s2336_s28 }
  0xda   :  { %v3109_v22 = vld [vmem:[%s4145_s3] sm:$0xff]   ;;  %v3112_v13 = vld [vmem:[%s4145_s3 + $0xc8] sm:$0xff]   ;;  %v3117_v26 = vld [vmem:[%s4145_s3 + $0x10] sm:$0xff]   ;;  %p3160_p1 = scmp.lt.s32.totalorder %s2337_s28, %s2337_s28 }
  0xdb   :  { %1770 = vmatpush1.bf16.msra.mxu0 %v3047_v41  ;;  %1942 = vmatpush1.bf16.msra.mxu1 %v3050_v42  ;;  %v3110_v14 = vld [vmem:[%s4145_s3 + $0x80] sm:$0xff]   ;;  %v3113_v16 = vld [vmem:[%s4145_s3 + $0x8] sm:$0xff]   ;;  %v3118_v27 = vld [vmem:[%s4145_s3 + $0x90] sm:$0xff]  }
  0xdc   :  { %1771 = vmatprep.subr.bf16.mxu0 %v3055_v43  ;;  %1943 = vmatprep.subr.bf16.mxu1 %v3058_v44  ;;  %v3114_v23 = vld [vmem:[%s4145_s3 + $0x88] sm:$0xff]   ;;  %v3119_v28 = vld [vmem:[%s4145_s3 + $0x58] sm:$0xff]   ;;  %v3123_v32 = vld [vmem:[%s4145_s3 + $0x60] sm:$0xff]  }
  0xdd   :  { %v3120_v29 = vld [vmem:[%s4145_s3 + $0xd8] sm:$0xff]   ;;  %v3124_v33 = vld [vmem:[%s4145_s3 + $0xe0] sm:$0xff]   ;;  %v3127_v36 = vld [vmem:[%s4145_s3 + $0x68] sm:$0xff]  }
  0xde   :  { %v3121_v30 = vld [vmem:[%s4145_s3 + $0x18] sm:$0xff]   ;;  %v3125_v34 = vld [vmem:[%s4145_s3 + $0x20] sm:$0xff]   ;;  %v3128_v37 = vld [vmem:[%s4145_s3 + $0xe8] sm:$0xff]  }
  0xdf   :  { %1772 = vmatpush1.bf16.msra.mxu0 %v3053_v45  ;;  %1944 = vmatpush1.bf16.msra.mxu1 %v3056_v46  ;;  %v3122_v31 = vld [vmem:[%s4145_s3 + $0x98] sm:$0xff]   ;;  %v3126_v35 = vld [vmem:[%s4145_s3 + $0xa0] sm:$0xff]   ;;  %v3129_v38 = vld [vmem:[%s4145_s3 + $0x28] sm:$0xff]  }
  0xe0   :  { %1773 = vmatprep.subr.bf16.mxu0 %v3061_v47  ;;  %1945 = vmatprep.subr.bf16.mxu1 %v3064_v48  ;;  %v3130_v39 = vld [vmem:[%s4145_s3 + $0xa8] sm:$0xff]   ;;  %v3131_v40 = vld [vmem:[%s4145_s3 + $0x70] sm:$0xff]   ;;  %v3135_v44 = vld [vmem:[%s4145_s3 + $0x78] sm:$0xff]   ;;  %v288_v48 = vlaneseq }
  0xe1   :  { %v3132_v41 = vld [vmem:[%s4145_s3 + $0xf0] sm:$0xff]   ;;  %v3136_v45 = vld [vmem:[%s4145_s3 + $0xf8] sm:$0xff]  }
  0xe2   :  { %v3133_v42 = vld [vmem:[%s4145_s3 + $0x30] sm:$0xff]   ;;  %v3137_v46 = vld [vmem:[%s4145_s3 + $0x38] sm:$0xff]  }
  0xe3   :  { %1774 = vmatpush1.bf16.msra.mxu0 %v3059_v49  ;;  %1946 = vmatpush1.bf16.msra.mxu1 %v3062_v50  ;;  %v3134_v43 = vld [vmem:[%s4145_s3 + $0xb0] sm:$0xff]   ;;  %v3138_v47 = vld [vmem:[%s4145_s3 + $0xb8] sm:$0xff]   ;;  %v289_v49 = vshrl.u32 %v288_v48, 7 }
  0xe4   :  { %1775 = vmatprep.subr.bf16.mxu0 %v3067_v51  ;;  %1947 = vmatprep.subr.bf16.mxu1 %v3070_v52  ;;  %v286_v52 = vld [vmem:[%s4144_s2] sm:$0xf] }
  0xe5   :  { %v290_v50 = vsub.s32 0, %v289_v49  ;;  %v298_v51 = vsub.s32 2, %v289_v49 }
  0xe7   :  { %1776 = vmatpush1.bf16.msra.mxu0 %v3065_v53  ;;  %1948 = vmatpush1.bf16.msra.mxu1 %v3068_v54  ;;  %v294_v53 = vsub.s32 1, %v289_v49  ;;  %v302_v54 = vsub.s32 3, %v289_v49 }
  0xe8   :  { %1777 = vmatprep.subr.bf16.mxu0 %v3073_v55  ;;  %1949 = vmatprep.subr.bf16.mxu1 %v3076_v56  ;;  %v291_v55 = vrot.slane %v286_v52, %v290_v50  ;;  %v299_v56 = vrot.slane %v286_v52, %v298_v51 }
  0xeb   :  { %1778 = vmatpush1.bf16.msra.mxu0 %v3071_v57  ;;  %1950 = vmatpush1.bf16.msra.mxu1 %v3074_v58  ;;  %v295_v57 = vrot.slane %v286_v52, %v294_v53  ;;  %v303_v58 = vrot.slane %v286_v52, %v302_v54 }
  0xec   :  { %1779 = vmatprep.subr.bf16.mxu0 %v3079_v59  ;;  %1951 = vmatprep.subr.bf16.mxu1 %v3082_v60 }
  0xef   :  { %1780 = vmatpush1.bf16.msra.mxu0 %v3077_v61  ;;  %1952 = vmatpush1.bf16.msra.mxu1 %v3080_v62 }
  0xf0   :  { %1781 = vmatprep.subr.bf16.mxu0 %v3085_v63  ;;  %1953 = vmatprep.subr.bf16.mxu1 %v3088_v0 }
  0xf3   :  { %1782 = vmatpush1.bf16.msra.mxu0 %v3083_v1  ;;  %1954 = vmatpush1.bf16.msra.mxu1 %v3086_v2 }
  0xf4   :  { %1783 = vmatprep.subr.bf16.mxu0 %v3091_v3  ;;  %1955 = vmatprep.subr.bf16.mxu1 %v3094_v4 }
  0xf7   :  { %1784 = vmatpush1.bf16.msra.mxu0 %v3089_v5  ;;  %1956 = vmatpush1.bf16.msra.mxu1 %v3092_v6 }
  0xf8   :  { %1785 = vmatprep.subr.bf16.mxu0 %v3097_v7  ;;  %1957 = vmatprep.subr.bf16.mxu1 %v3100_v8 }
  0xfb   :  { %1786 = vmatpush1.bf16.msra.mxu0 %v3095_v9  ;;  %1958 = vmatpush1.bf16.msra.mxu1 %v3098_v10 }
  0xfc   :  { %1787 = vmatprep.subr.bf16.mxu0 %v3103_v11  ;;  %1959 = vmatprep.subr.bf16.mxu1 %v3106_v12 }
  0xff   :  { %1788 = vmatpush1.bf16.msra.mxu0 %v3101_v17  ;;  %1960 = vmatpush1.bf16.msra.mxu1 %v3104_v18 }
 0x100   :  { %2644 = vmatprep.subr.bf16.mxu0 %v3107_v19  ;;  %2666 = vmatprep.subr.bf16.mxu1 %v3108_v20 }
 0x102   :  { %1790 = vmatmul.mubr.bf16.vlgmr.msra.gmra.mrb[0].mxu0 %v2353_v21  ;;  %1962 = vmatmul.mubr.bf16.vlgmr.msra.gmra.mrb[0].mxu1 %v2353_v21 }
 0x103   :  { %2645 = vmatpush3.bf16.msra.mxu0 %v3109_v22  ;;  %2667 = vmatpush3.bf16.msra.mxu1 %v3110_v14 }
 0x104   :  { %2646 = vmatprep.subr.bf16.mxu0 %v3111_v15  ;;  %2668 = vmatprep.subr.bf16.mxu1 %v3112_v13 }
 0x107   :  { %2647 = vmatpush3.bf16.msra.mxu0 %v3113_v16  ;;  %2669 = vmatpush3.bf16.msra.mxu1 %v3114_v23 }
 0x108   :  { %2648 = vmatprep.subr.bf16.mxu0 %v3115_v24  ;;  %2670 = vmatprep.subr.bf16.mxu1 %v3116_v25  ;;  %v2611_v25 = vld [vmem:[%s4146_s4] ss:$0 sm:$0xff]  ;;  %s3155_s4 = scalar_lea.vmem %s2337_s28, 256 }
 0x109   :  { %p3156_p0 = scmp.ne.s32.totalorder %s2337_s28, %s3155_s4  ;;  %p3161_p2 = scmp.lt.s32.totalorder %s3155_s4, %s3155_s4 }
 0x10b   :  { %2649 = vmatpush3.bf16.msra.mxu0 %v3117_v26  ;;  %2671 = vmatpush3.bf16.msra.mxu1 %v3118_v27  ;;  %p3162_p3 = por %p3161_p2, %p3160_p1 }
 0x10c   :  { %2650 = vmatprep.subr.bf16.mxu0 %v3119_v28  ;;  %2672 = vmatprep.subr.bf16.mxu1 %v3120_v29 }
 0x10d   :  { %p3163_p4 = pnand %p3162_p3, %p3156_p0 }
 0x10f   :  { %2651 = vmatpush3.bf16.msra.mxu0 %v3121_v30  ;;  %2673 = vmatpush3.bf16.msra.mxu1 %v3122_v31 }
 0x110   :  { %2652 = vmatprep.subr.bf16.mxu0 %v3123_v32  ;;  %2674 = vmatprep.subr.bf16.mxu1 %v3124_v33 }
 0x113   :  { %2653 = vmatpush3.bf16.msra.mxu0 %v3125_v34  ;;  %2675 = vmatpush3.bf16.msra.mxu1 %v3126_v35 }
 0x114   :  { %2654 = vmatprep.subr.bf16.mxu0 %v3127_v36  ;;  %2676 = vmatprep.subr.bf16.mxu1 %v3128_v37 }
 0x117   :  { %2655 = vmatpush3.bf16.msra.mxu0 %v3129_v38  ;;  %2677 = vmatpush3.bf16.msra.mxu1 %v3130_v39 }
 0x118   :  { %2656 = vmatprep.subr.bf16.mxu0 %v3131_v40  ;;  %2678 = vmatprep.subr.bf16.mxu1 %v3132_v41 }
 0x11b   :  { %2657 = vmatpush3.bf16.msra.mxu0 %v3133_v42  ;;  %2679 = vmatpush3.bf16.msra.mxu1 %v3134_v43 }
 0x11c   :  { %2658 = vmatprep.subr.bf16.mxu0 %v3135_v44  ;;  %2680 = vmatprep.subr.bf16.mxu1 %v3136_v45 }
 0x11f   :  { %2659 = vmatpush3.bf16.msra.mxu0 %v3137_v46  ;;  %2681 = vmatpush3.bf16.msra.mxu1 %v3138_v47 }
 0x1d5   :  { %v1791_v59 = vpop.f32.mrb[0].mxu0  ;;  %v1963_v60 = vpop.f32.mrb[0].mxu1 }
 0x1d6   :  { %v2688_v61 = vadd.f32 %v1791_v59, %v291_v55  ;;  %v2692_v62 = vadd.f32 %v1963_v60, %v299_v56  ;;  %v1793_v63 = vpop.f32.mrb[1].mxu0  ;;  %v1965_v0 = vpop.f32.mrb[1].mxu1 }
 0x1d7   :  { %v2689_v1 = vadd.f32 %v1793_v63, %v295_v57  ;;  %v2693_v2 = vadd.f32 %v1965_v0, %v303_v58  ;;  %v1795_v3 = vpop.f32.mrb[2].mxu0  ;;  %v1967_v4 = vpop.f32.mrb[2].mxu1 }
 0x1d8   :  { %3139 = vtanh.f32 %v2688_v61  ;;  %v2690_v5 = vadd.f32 %v1795_v3, %v291_v55  ;;  %v1797_v6 = vpop.f32.mrb[3].mxu0  ;;  %v1969_v7 = vpop.f32.mrb[3].mxu1  ;;  %v2694_v8 = vadd.f32 %v1967_v4, %v299_v56 }
 0x1d9   :  { %3141 = vtanh.f32 %v2692_v62  ;;  %v2691_v9 = vadd.f32 %v1797_v6, %v295_v57  ;;  %v2695_v10 = vadd.f32 %v1969_v7, %v303_v58 }
 0x1da   :  { %3143 = vtanh.f32 %v2689_v1 }
 0x1db   :  { %3145 = vtanh.f32 %v2693_v2 }
 0x1dc   :  { %3147 = vtanh.f32 %v2690_v5 }
 0x1dd   :  { %3149 = vtanh.f32 %v2694_v8 }
 0x1de   :  { %3151 = vtanh.f32 %v2691_v9 }
 0x1df   :  { %3153 = vtanh.f32 %v2695_v10 }
 0x1e2   :  { %v3140_v11 = vpop.eup %3139 }
 0x1e3   :  { %v3142_v12 = vpop.eup %3141 }
 0x1e4   :  { %v3144_v17 = vpop.eup %3143 }
 0x1e5   :  { %v3146_v18 = vpop.eup %3145 }
 0x1e6   :  { %v3148_v19 = vpop.eup %3147 }
 0x1e7   :  { %v3150_v20 = vpop.eup %3149  ;;  %v1980_v21 = vpack.c.bf16 %v3148_v19, %v3140_v11 }
 0x1e8   :  { %v3152_v22 = vpop.eup %3151  ;;  %v1982_v14 = vpack.c.bf16 %v3150_v20, %v3142_v12 }
 0x1e9   :  { %v3154_v15 = vpop.eup %3153  ;;  %v1981_v13 = vpack.c.bf16 %v3152_v22, %v3144_v17 }
 0x1ea   :  { %v1983_v16 = vpack.c.bf16 %v3154_v15, %v3146_v18 }
 0x1eb   :  { %2279 = vmatprep.mubr.bf16.mxu0 %v1981_v13 }
 0x1ec   :  { %2320 = vmatprep.mubr.bf16.mxu1 %v1983_v16  ;;  %2280 = vmatmul.mubr.bf16.vlgmr.msra.gmra.mrb[4].mxu0 %v1980_v21 }
 0x1ed   :  { %2321 = vmatmul.mubr.bf16.vlgmr.msra.gmra.mrb[4].mxu1 %v1982_v14 }
 0x2bf   :  { %v2660_v23 = vpop.f32.mrb[4].mxu0 }
 0x2c0   :  { %v2682_v24 = vpop.f32.mrb[4].mxu1  ;;  %v2661_v26 = vpop.f32.mrb[5].mxu0 }
 0x2c1   :  { %v2662_v27 = vadd.f32 %v2661_v26, %v2660_v23  ;;  %v2683_v28 = vpop.f32.mrb[5].mxu1  ;;  %v2663_v29 = vpop.f32.mrb[6].mxu0 }
 0x2c2   :  { %v2684_v30 = vadd.f32 %v2683_v28, %v2682_v24  ;;  %v2685_v31 = vpop.f32.mrb[6].mxu1  ;;  %v2664_v32 = vpop.f32.mrb[7].mxu0 }
 0x2c3   :  { %v2282_v33 = vadd.f32 %v2662_v27, %v2611_v25  ;;  %v2665_v34 = vadd.f32 %v2664_v32, %v2663_v29  ;;  %v2686_v35 = vpop.f32.mrb[7].mxu1 }
 0x2c4   :  { %v2687_v36 = vadd.f32 %v2686_v35, %v2685_v31 }
 0x2c5   :  { %v2323_v37 = vadd.f32 %v2684_v30, %v2282_v33  ;;  %v2285_v38 = vadd.f32 %v2665_v34, %v2611_v25 }
 0x2c7   :  { %2329 = vst [vmem:[#allocation2] sm:$0xff] %v2323_v37  ;;  %v2326_v39 = vadd.f32 %v2687_v36, %v2285_v38 }
 0x2c9   :  { %2330 = vst [vmem:[#allocation2 + $0x8] sm:$0xff] %v2326_v39 }
 0x2ca   :  { %3166 = shalt.err (!%p3163_p4)
}
 0x2cb   :  { %s3167_s30 = scalar_lea.hbm %s4147_s5, 256 }
 0x2cc   :  { %p3168_p5 = scmp.ne.s32.totalorder %s4147_s5, %s3167_s30  ;;  %p3171_p6 = scmp.lt.u32.totalorder %s3167_s30, %s4147_s5 }
 0x2ce   :  { %p3173_p7 = pnand %p3171_p6, %p3168_p5 }
 0x2d0   :  { %3176 = shalt.err (!%p3173_p7)
}
 0x2d1   :  { %s3180_s10 = smov 128   ;;  %s3181_s11 = smov 8  }
 0x2d2   :  { %2342 = dma.vmem_to_hbm [thread:$0]  %s2337_s28, 256, %s4147_s5, [#allocation3], %s3180_s10, %s3180_s10, %s3181_s11  }
 0x2d3   :  { %3177 = dma.done.wait [#allocation3], 256  }
 0x2d4   :  { %3178 = vsyncadd [#allocation3], 4294967040 }
 0x2d5   :  { %2346 = vsyncpa [#allocation3], 1 }

</bundles_post_ra>
